<compile_context>
chip_gen: v7x
topology: tpu7x:2x2x1
jax: 0.10.0
libtpu: 0.0.40
codegen_flags: <defaults>
</compile_context>

<pallas_src>
import functools

import jax
import jax.numpy as jnp
from jax.experimental import pallas as pl
from jax.experimental.pallas import tpu as pltpu

_LANE = 128


def _round_up(v, m):
    return ((v + m - 1) // m) * m


# ----------------------------- Pallas kernel -------------------------------- #

def _gcn_layer_kernel(adj_ref, x_ref, wt_ref, b_ref, out_ref, *, relu, normalize):
    """One GraphConv layer, one adjacency row tile.

    adj_ref: (tm, Np)        bf16  -- streamed/double-buffered adj row tile
    x_ref:   (Np, cin_p)     bf16  -- full activation slab (VMEM-resident)
    wt_ref:  (cin_p, cout_p) bf16  -- pre-transposed weight (kernel does x @ Wt)
    b_ref:   (1, cout_p)     f32
    out_ref: (tm, cout_p)    bf16 (hidden layers) / f32 (last layer)
    """
    # N^2 term: adj_tile @ x, bf16 x bf16 -> f32 accumulation on the MXU.
    t = jnp.dot(adj_ref[...], x_ref[...], preferred_element_type=jnp.float32)
    # Channel matmul: also bf16 x bf16 -> f32 (cast only the (tm, cin_p) tile).
    out = jnp.dot(t.astype(jnp.bfloat16), wt_ref[...],
                  preferred_element_type=jnp.float32)
    out = out + b_ref[...]
    if relu:
        out = jnp.maximum(out, 0.0)
    if normalize:
        # Row-wise L2 normalize == F.normalize (eps = 1e-12); rsqrt on the EUP.
        ss = jnp.sum(out * out, axis=1, keepdims=True)
        out = out * jax.lax.rsqrt(jnp.maximum(ss, 1e-24))
    out_ref[...] = out.astype(out_ref.dtype)


# ----------------------------- Tiling / VMEM sizing -------------------------- #

def _pick_tile_rows(np_):
    """Adj row-tile size: prefer 512 (best measured BlockSpec pipelining on
    v5e/v6e), shrink so the double-buffered adj tile stays <= ~24 MiB, which
    also keeps the total footprint inside v7x's 64 MiB VMEM."""
    for tm in (512, 256, 128):
        if np_ % tm == 0 and 2 * tm * np_ * 2 <= (24 << 20):
            return tm
    return _LANE


def _layer_vmem_limit(tm, np_, cin_p, cout_p, out_bytes):
    est = (2 * tm * np_ * 2           # adj row tile, double buffered (bf16)
           + 2 * np_ * cin_p * 2      # resident activation slab (bf16)
           + 2 * cin_p * cout_p * 2   # weight (bf16)
           + 2 * 8 * cout_p * 4       # bias ((1,C) tiles to (8,C) f32)
           + 2 * tm * cout_p * out_bytes)  # output tile, double buffered
    return int(min(max(est * 3 // 2 + (4 << 20), 32 << 20), 112 << 20))


# ----------------------------- Python wrapper ------------------------------- #

def gcn_forward(x, adj, params, layer_specs):
    """GCN forward: one row-tiled Pallas call per GraphConv layer.

    x:   (N, C_in) float32 node features
    adj: (N, N)    float32 dense (normalized) adjacency
    params:      list of (W (c_out, c_in), b (1, c_out)) per layer
    layer_specs: list of (c_in, c_out, relu) per layer
    """
    n, c0 = x.shape
    np_ = _round_up(n, _LANE)                 # lane-aligned N
    tm = _pick_tile_rows(np_)
    grid = (np_ // tm,)

    c0p = _round_up(c0, _LANE)
    # Zero-padded, lane-aligned operands; MXU operands are bf16, accumulation
    # inside the kernel is f32.
    adj_p = jnp.zeros((np_, np_), jnp.float32).at[:n, :n].set(
        adj.astype(jnp.float32)).astype(jnp.bfloat16)
    h = jnp.zeros((np_, c0p), jnp.float32).at[:n, :c0].set(
        x.astype(jnp.float32)).astype(jnp.bfloat16)

    num_layers = len(layer_specs)
    for li, ((w, b), (c_in, c_out, relu)) in enumerate(zip(params, layer_specs)):
        is_last = li == num_layers - 1
        cin_p = _round_up(c_in, _LANE)
        cout_p = _round_up(c_out, _LANE)

        # Pre-transposed bf16 weight (kernel does x @ Wt -> no in-kernel XLU
        # transpose); zero padding keeps padded feature columns exactly zero.
        wt = (jnp.zeros((cin_p, cout_p), jnp.float32)
              .at[:c_in, :c_out].set(jnp.asarray(w, jnp.float32).T)
              .astype(jnp.bfloat16))
        b_p = (jnp.zeros((1, cout_p), jnp.float32)
               .at[:, :c_out].set(jnp.reshape(jnp.asarray(b, jnp.float32), (1, -1))))

        out_dtype = jnp.float32 if is_last else jnp.bfloat16
        kernel = functools.partial(_gcn_layer_kernel,
                                   relu=bool(relu), normalize=is_last)

        h = pl.pallas_call(
            kernel,
            out_shape=jax.ShapeDtypeStruct((np_, cout_p), out_dtype),
            grid=grid,
            in_specs=[
                pl.BlockSpec((tm, np_), lambda i: (i, 0)),       # adj row tile
                pl.BlockSpec((np_, cin_p), lambda i: (0, 0)),    # full act slab
                pl.BlockSpec((cin_p, cout_p), lambda i: (0, 0)),  # weight
                pl.BlockSpec((1, cout_p), lambda i: (0, 0)),      # bias
            ],
            out_specs=pl.BlockSpec((tm, cout_p), lambda i: (i, 0)),
            compiler_params=pltpu.CompilerParams(
                dimension_semantics=("parallel",),                # v7x megacore
                vmem_limit_bytes=_layer_vmem_limit(
                    tm, np_, cin_p, cout_p, jnp.dtype(out_dtype).itemsize),
            ),
        )(adj_p, h, wt, b_p)

    c_last = layer_specs[-1][1]
    return h[:n, :c_last]


# ----------------------------- Model construction --------------------------- #

def parse_hidden_layers(in_channels, out_channels, hidden_layers):
    """Replicates GCN.__init__ layer-spec parsing ('d' prefixes = dropout)."""
    hl = hidden_layers.split(',')
    if hl[-1] == 'd':
        hl = hl[:-1]
    specs = []
    last_c = in_channels
    for c in hl:
        if c[0] == 'd':
            c = c[1:]
        c = int(c)
        specs.append((last_c, c, True))       # dropout is identity at eval time
        last_c = c
    specs.append((last_c, out_channels, False))
    return specs


def init_params(key, layer_specs):
    """Deterministic init matching nn.Linear defaults: U(-1/sqrt(fan_in), +)."""
    params = []
    for (c_in, c_out, _) in layer_specs:
        key, kw, kb = jax.random.split(key, 3)
        bound = 1.0 / (c_in ** 0.5)
        w = jax.random.uniform(kw, (c_out, c_in), jnp.float32, -bound, bound)
        b = jax.random.uniform(kb, (1, c_out), jnp.float32, -bound, bound)
        params.append((w, b))
    return params


def gcn_reference(x, adj, params, layer_specs):
    """Pure-JAX f32 reference replicating the PyTorch forward exactly."""
    for (w, b), (_, _, relu) in zip(params, layer_specs):
        h = x @ jnp.asarray(w, jnp.float32).T
        out = adj @ h + jnp.reshape(jnp.asarray(b, jnp.float32), (1, -1))
        if relu:
            out = jnp.maximum(out, 0.0)
        x = out
    norm = jnp.sqrt(jnp.sum(x * x, axis=1, keepdims=True))
    return x / jnp.maximum(norm, 1e-12)


# ----------------------------- Demo / smoke test ----------------------------- #

if __name__ == "__main__":
    key = jax.random.PRNGKey(0)

    N = 32
    in_channels = 16
    out_channels = 8
    hidden_layers = "32,d16"   # GraphConv(16,32,relu) -> (32,16,relu) -> (16,8)

    layer_specs = parse_hidden_layers(in_channels, out_channels, hidden_layers)

    key, kx, ka, kp = jax.random.split(key, 4)
    x = jax.random.normal(kx, (N, in_channels), jnp.float32)

    # TODO(synk): normt_spm/spm_to_tensor use scipy sparse matrices; the demo
    # builds the equivalent dense in-degree-normalized adjacency directly.
    a_raw = jax.random.uniform(ka, (N, N), jnp.float32) + jnp.eye(N, dtype=jnp.float32)
    a_t = a_raw.T
    adj = a_t / jnp.sum(a_t, axis=1, keepdims=True)

    params = init_params(kp, layer_specs)

    out = gcn_forward(x, adj, params, layer_specs)
    out = jax.block_until_ready(out)

    # Sanity: shape, unit row norms after the F.normalize equivalent, and
    # agreement with the pure-JAX f32 reference (tolerance covers the bf16
    # adj / weight / activation operands).
    assert out.shape == (N, out_channels)
    row_norms = jnp.linalg.norm(out, axis=1)
    assert bool(jnp.all(jnp.abs(row_norms - 1.0) < 1e-3))

    ref = gcn_reference(x, adj, params, layer_specs)
    assert bool(jnp.all(jnp.abs(out - ref) < 5e-2))

    print("KERNEL_OK")
</pallas_src>

<mosaic_0001>
module attributes {stable_mosaic.version = 11 : i64} {
  func.func @_gcn_layer_kernel(%arg0: i32, %arg1: memref<128x128xbf16, #tpu.memory_space<vmem>>, %arg2: memref<128x128xbf16, #tpu.memory_space<vmem>>, %arg3: memref<128x128xbf16, #tpu.memory_space<vmem>>, %arg4: memref<1x128xf32, #tpu.memory_space<vmem>>, %arg5: memref<128x128xbf16, #tpu.memory_space<vmem>>) attributes {dimension_semantics = [#tpu.dimension_semantics<parallel>], iteration_bounds = array<i64: 1>, scalar_prefetch = 0 : i64, scratch_operands = 0 : i64, tpu.core_type = #tpu.core_type<tc>, window_params = [{transform_indices = @transform_0, window_bounds = array<i64: 128, 128>}, {pipeline_mode = #tpu.pipeline_mode<synchronous>, transform_indices = @transform_1, window_bounds = array<i64: 128, 128>}, {pipeline_mode = #tpu.pipeline_mode<synchronous>, transform_indices = @transform_2, window_bounds = array<i64: 128, 128>}, {pipeline_mode = #tpu.pipeline_mode<synchronous>, transform_indices = @transform_3, window_bounds = array<i64: 1, 128>}, {transform_indices = @transform_4, window_bounds = array<i64: 128, 128>}]} {
    %c0 = arith.constant 0 : index
    %c0_0 = arith.constant 0 : index
    %0 = vector.load %arg1[%c0, %c0_0] : memref<128x128xbf16, #tpu.memory_space<vmem>>, vector<128x128xbf16>
    %c0_1 = arith.constant 0 : index
    %c0_2 = arith.constant 0 : index
    %1 = vector.load %arg2[%c0_1, %c0_2] : memref<128x128xbf16, #tpu.memory_space<vmem>>, vector<128x128xbf16>
    %cst = arith.constant dense<0.000000e+00> : vector<128x128xf32>
    %2 = tpu.matmul %0, %1, %cst {dimension_numbers = #tpu.dot_dimension_numbers<[1], [0], [0], [1], [0, 0, 1, 1], [], []>} : vector<128x128xbf16>, vector<128x128xbf16>, vector<128x128xf32> -> vector<128x128xf32>
    %3 = arith.truncf %2 : vector<128x128xf32> to vector<128x128xbf16>
    %c0_3 = arith.constant 0 : index
    %c0_4 = arith.constant 0 : index
    %4 = vector.load %arg3[%c0_3, %c0_4] : memref<128x128xbf16, #tpu.memory_space<vmem>>, vector<128x128xbf16>
    %cst_5 = arith.constant dense<0.000000e+00> : vector<128x128xf32>
    %5 = tpu.matmul %3, %4, %cst_5 {dimension_numbers = #tpu.dot_dimension_numbers<[1], [0], [0], [1], [0, 0, 1, 1], [], []>} : vector<128x128xbf16>, vector<128x128xbf16>, vector<128x128xf32> -> vector<128x128xf32>
    %c0_6 = arith.constant 0 : index
    %c0_7 = arith.constant 0 : index
    %6 = vector.load %arg4[%c0_6, %c0_7] : memref<1x128xf32, #tpu.memory_space<vmem>>, vector<1x128xf32>
    %7 = vector.broadcast %6 : vector<1x128xf32> to vector<128x128xf32>
    %8 = arith.addf %5, %7 : vector<128x128xf32>
    %cst_8 = arith.constant 0.000000e+00 : f32
    %9 = vector.broadcast %cst_8 : f32 to vector<128x128xf32>
    %10 = arith.maximumf %8, %9 : vector<128x128xf32>
    %11 = arith.truncf %10 : vector<128x128xf32> to vector<128x128xbf16>
    %c0_9 = arith.constant 0 : index
    %c0_10 = arith.constant 0 : index
    %12 = vector.load %arg5[%c0_9, %c0_10] : memref<128x128xbf16, #tpu.memory_space<vmem>>, vector<128x128xbf16>
    tpu.vector_store %arg5[%c0_9, %c0_10], %11 {strides = array<i32>} : memref<128x128xbf16, #tpu.memory_space<vmem>>, vector<128x128xbf16>,
    return
  }
  func.func @transform_0(%arg0: i32) -> (i32, i32) {
    %c0_i32 = arith.constant 0 : i32
    %c0_i32_0 = arith.constant 0 : i32
    return %arg0, %c0_i32 : i32, i32
  }
  func.func @transform_1(%arg0: i32) -> (i32, i32) {
    %c0_i32 = arith.constant 0 : i32
    %c0_i32_0 = arith.constant 0 : i32
    %c0_i32_1 = arith.constant 0 : i32
    return %c0_i32, %c0_i32_0 : i32, i32
  }
  func.func @transform_2(%arg0: i32) -> (i32, i32) {
    %c0_i32 = arith.constant 0 : i32
    %c0_i32_0 = arith.constant 0 : i32
    %c0_i32_1 = arith.constant 0 : i32
    return %c0_i32, %c0_i32_0 : i32, i32
  }
  func.func @transform_3(%arg0: i32) -> (i32, i32) {
    %c0_i32 = arith.constant 0 : i32
    %c0_i32_0 = arith.constant 0 : i32
    %c0_i32_1 = arith.constant 0 : i32
    return %c0_i32, %c0_i32_0 : i32, i32
  }
  func.func @transform_4(%arg0: i32) -> (i32, i32) {
    %c0_i32 = arith.constant 0 : i32
    %c0_i32_0 = arith.constant 0 : i32
    return %arg0, %c0_i32 : i32, i32
  }
}

</mosaic_0001>

<bundles_post_ra>
// kernel: tpu_custom_call.1
= control target key start
LH: loop header
LB: loop body
LE: loop exit
PB: predicated region body
PF: predicated region fallthrough
CT: control target
= control target key end

     0   :  { %9 = vsyncpa [#allocation3], 0  ;;  %s1000_s0 = inlined_call_operand.hbm [shape: bf16[128,128], index: 0, kind: input, shape index: {}]   ;;  %s1001_s1 = inlined_call_operand.hbm [shape: bf16[128,128], index: 1, kind: input, shape index: {}]   ;;  %s1002_s2 = inlined_call_operand.hbm [shape: bf16[128,128], index: 2, kind: input, shape index: {}]   ;;  %s1003_s3 = inlined_call_operand.vmem [shape: f32[1,128], index: 3, kind: input, shape index: {}]   ;;  %s1004_s4 = inlined_call_operand.hbm [shape: bf16[128,128], index: 4, kind: output, shape index: {}]  }
   0x1   :  { %10 = vsyncpa [#allocation6], 0 }
   0x2   :  { %11 = vsyncpa [#allocation4], 0  ;;  %s899_s15 = smov [#allocation5]   ;;  %s900_s17 = smov [#allocation2]  }
   0x3   :  { %s29_s16 = sshll.u32 %s899_s15, 4  ;;  %s17_s18 = sshll.u32 %s900_s17, 4  ;;  %s30_s16 = int_to_ptr.vmem [resolvable:$true] %s29_s16  ;;  %s930_s18 = int_to_ptr.vmem [resolvable:$true] %s17_s18 }
   0x4   :  { %s805_s21 = scalar_lea.hbm %s1001_s1, 1024 }
   0x5   :  { %p806_p0 = scmp.ne.s32.totalorder %s1001_s1, %s805_s21  ;;  %p809_p1 = scmp.lt.u32.totalorder %s805_s21, %s1001_s1 }
   0x7   :  { %p811_p2 = pnand %p809_p1, %p806_p0 }
   0x9   :  { %814 = shalt.err (!%p811_p2)
}
   0xa   :  { %s815_s26 = scalar_lea.vmem %s30_s16, 1024  ;;  %p820_p4 = scmp.lt.s32.totalorder %s30_s16, %s30_s16 }
   0xb   :  { %p816_p3 = scmp.ne.s32.totalorder %s30_s16, %s815_s26  ;;  %p821_p5 = scmp.lt.s32.totalorder %s815_s26, %s815_s26 }
   0xd   :  { %p822_p6 = por %p821_p5, %p820_p4 }
   0xf   :  { %p823_p7 = pnand %p822_p6, %p816_p3 }
  0x11   :  { %826 = shalt.err (!%p823_p7)
}
  0x12   :  { %s901_s27 = smov 64   ;;  %s902_s28 = smov 4  }
  0x13   :  { %35 = dma.hbm_to_vmem [thread:$0]  %s1001_s1, 1024, %s30_s16, [#allocation6], %s901_s27, %s901_s27, %s902_s28  }
  0x14   :  { %s827_s7 = scalar_lea.hbm %s1000_s0, 1024 }
  0x15   :  { %p828_p8 = scmp.ne.s32.totalorder %s1000_s0, %s827_s7  ;;  %p831_p9 = scmp.lt.u32.totalorder %s827_s7, %s1000_s0 }
  0x17   :  { %p833_p10 = pnand %p831_p9, %p828_p8 }
  0x19   :  { %836 = shalt.err (!%p833_p10)
}
  0x1a   :  { %s837_s12 = scalar_lea.vmem %s930_s18, 1024  ;;  %p842_p12 = scmp.lt.s32.totalorder %s930_s18, %s930_s18 }
  0x1b   :  { %p838_p11 = scmp.ne.s32.totalorder %s930_s18, %s837_s12  ;;  %p843_p13 = scmp.lt.s32.totalorder %s837_s12, %s837_s12 }
  0x1d   :  { %p844_p0 = por %p843_p13, %p842_p12 }
  0x1f   :  { %p845_p1 = pnand %p844_p0, %p838_p11 }
  0x21   :  { %848 = shalt.err (!%p845_p1)
}
  0x22   :  { %23 = dma.hbm_to_vmem [thread:$0]  %s1000_s0, 1024, %s930_s18, [#allocation3], %s901_s27, %s901_s27, %s902_s28  }
  0x23   :  { %s903_s14 = smov [#allocation7]   ;;  %s849_s19 = scalar_lea.hbm %s1002_s2, 1024 }
  0x24   :  { %s41_s15 = sshll.u32 %s903_s14, 4  ;;  %p850_p2 = scmp.ne.s32.totalorder %s1002_s2, %s849_s19  ;;  %s42_s15 = int_to_ptr.vmem [resolvable:$true] %s41_s15 }
  0x25   :  { %p853_p3 = scmp.lt.u32.totalorder %s849_s19, %s1002_s2 }
  0x27   :  { %p855_p4 = pnand %p853_p3, %p850_p2 }
  0x29   :  { %858 = shalt.err (!%p855_p4)
}
  0x2a   :  { %s859_s24 = scalar_lea.vmem %s42_s15, 1024  ;;  %p864_p6 = scmp.lt.s32.totalorder %s42_s15, %s42_s15 }
  0x2b   :  { %p860_p5 = scmp.ne.s32.totalorder %s42_s15, %s859_s24  ;;  %p865_p7 = scmp.lt.s32.totalorder %s859_s24, %s859_s24 }
  0x2d   :  { %p866_p8 = por %p865_p7, %p864_p6 }
  0x2f   :  { %p867_p9 = pnand %p866_p8, %p860_p5 }
  0x31   :  { %870 = shalt.err (!%p867_p9)
}
  0x32   :  { %47 = dma.hbm_to_vmem [thread:$0]  %s1002_s2, 1024, %s42_s15, [#allocation6], %s901_s27, %s901_s27, %s902_s28  }
  0x33   :  { %893 = dma.done.wait [#allocation3], 1024  }
  0x34   :  { %894 = vsyncadd [#allocation3], 4294966272 }
  0x35   :  { %895 = dma.done.wait [#allocation6], 2048  }
  0x36   :  { %896 = vsyncadd [#allocation6], 4294965248  ;;  %v781_v0 = vld [vmem:[#allocation5] sm:$0xff]   ;;  %v782_v1 = vld [vmem:[#allocation5 + $0x8] sm:$0xff]  }
  0x37   :  { %711 = vmatprep.subr.bf16.mxu0 %v781_v0  ;;  %v783_v2 = vld [vmem:[#allocation5 + $0x10] sm:$0xff]   ;;  %v784_v3 = vld [vmem:[#allocation5 + $0x18] sm:$0xff]   ;;  %v789_v4 = vld [vmem:[#allocation2] sm:$0xff]  }
  0x38   :  { %712 = vmatpush3.bf16.msra.mxu0 %v781_v0  ;;  %727 = vmatprep.mubr.bf16.mxu0 %v789_v4  ;;  %v785_v5 = vld [vmem:[#allocation5 + $0x20] sm:$0xff]   ;;  %v786_v6 = vld [vmem:[#allocation5 + $0x28] sm:$0xff]   ;;  %v787_v9 = vld [vmem:[#allocation5 + $0x30] sm:$0xff]  }
  0x39   :  { %713 = vmatprep.subr.bf16.mxu0 %v782_v1  ;;  %v797_v7 = vld [vmem:[#allocation7] sm:$0xff]   ;;  %v798_v8 = vld [vmem:[#allocation7 + $0x8] sm:$0xff]   ;;  %v799_v10 = vld [vmem:[#allocation7 + $0x10] sm:$0xff]  }
  0x3a   :  { %743 = vmatprep.subr.bf16.mxu1 %v797_v7  ;;  %v788_v11 = vld [vmem:[#allocation5 + $0x38] sm:$0xff]   ;;  %v801_v13 = vld [vmem:[#allocation7 + $0x20] sm:$0xff]   ;;  %v790_v14 = vld [vmem:[#allocation2 + $0x8] sm:$0xff]  }
  0x3b   :  { %744 = vmatpush3.bf16.msra.mxu1 %v797_v7  ;;  %v800_v12 = vld [vmem:[#allocation7 + $0x18] sm:$0xff]   ;;  %v791_v15 = vld [vmem:[#allocation2 + $0x10] sm:$0xff]   ;;  %v802_v16 = vld [vmem:[#allocation7 + $0x28] sm:$0xff]  }
  0x3c   :  { %714 = vmatpush3.bf16.msra.mxu0 %v782_v1  ;;  %745 = vmatprep.subr.bf16.mxu1 %v798_v8  ;;  %v803_v17 = vld [vmem:[#allocation7 + $0x30] sm:$0xff]   ;;  %v792_v18 = vld [vmem:[#allocation2 + $0x18] sm:$0xff]   ;;  %v793_v19 = vld [vmem:[#allocation2 + $0x20] sm:$0xff]  }
  0x3d   :  { %715 = vmatprep.subr.bf16.mxu0 %v783_v2  ;;  %v794_v20 = vld [vmem:[#allocation2 + $0x28] sm:$0xff]   ;;  %v795_v21 = vld [vmem:[#allocation2 + $0x30] sm:$0xff]   ;;  %v796_v22 = vld [vmem:[#allocation2 + $0x38] sm:$0xff]  }
  0x3e   :  { %v804_v23 = vld [vmem:[#allocation7 + $0x38] sm:$0xff]   ;;  %v591_v48 = vld [vmem:[%s1003_s3] ss:$0 sm:$0xff]  ;;  %s904_s3 = smov [#allocation8]  }
  0x3f   :  { %746 = vmatpush3.bf16.msra.mxu1 %v798_v8  ;;  %s562_s26 = sshll.u32 %s904_s3, 4  ;;  %s563_s26 = int_to_ptr.vmem [resolvable:$true] %s562_s26 }
  0x40   :  { %716 = vmatpush3.bf16.msra.mxu0 %v783_v2  ;;  %747 = vmatprep.subr.bf16.mxu1 %v799_v10  ;;  %s871_s29 = scalar_lea.vmem %s563_s26, 1024  ;;  %p876_p11 = scmp.lt.s32.totalorder %s563_s26, %s563_s26 }
  0x41   :  { %717 = vmatprep.subr.bf16.mxu0 %v784_v3  ;;  %p872_p10 = scmp.ne.s32.totalorder %s563_s26, %s871_s29  ;;  %p877_p12 = scmp.lt.s32.totalorder %s871_s29, %s871_s29 }
  0x43   :  { %748 = vmatpush3.bf16.msra.mxu1 %v799_v10  ;;  %p878_p13 = por %p877_p12, %p876_p11 }
  0x44   :  { %718 = vmatpush3.bf16.msra.mxu0 %v784_v3  ;;  %749 = vmatprep.subr.bf16.mxu1 %v800_v12 }
  0x45   :  { %719 = vmatprep.subr.bf16.mxu0 %v785_v5  ;;  %p879_p0 = pnand %p878_p13, %p872_p10 }
  0x47   :  { %750 = vmatpush3.bf16.msra.mxu1 %v800_v12 }
  0x48   :  { %720 = vmatpush3.bf16.msra.mxu0 %v785_v5  ;;  %751 = vmatprep.subr.bf16.mxu1 %v801_v13 }
  0x49   :  { %721 = vmatprep.subr.bf16.mxu0 %v786_v6 }
  0x4b   :  { %752 = vmatpush3.bf16.msra.mxu1 %v801_v13 }
  0x4c   :  { %722 = vmatpush3.bf16.msra.mxu0 %v786_v6  ;;  %753 = vmatprep.subr.bf16.mxu1 %v802_v16 }
  0x4d   :  { %723 = vmatprep.subr.bf16.mxu0 %v787_v9 }
  0x4f   :  { %754 = vmatpush3.bf16.msra.mxu1 %v802_v16 }
  0x50   :  { %724 = vmatpush3.bf16.msra.mxu0 %v787_v9  ;;  %755 = vmatprep.subr.bf16.mxu1 %v803_v17 }
  0x51   :  { %725 = vmatprep.subr.bf16.mxu0 %v788_v11 }
  0x53   :  { %756 = vmatpush3.bf16.msra.mxu1 %v803_v17 }
  0x54   :  { %726 = vmatpush3.bf16.msra.mxu0 %v788_v11  ;;  %757 = vmatprep.subr.bf16.mxu1 %v804_v23 }
  0x57   :  { %728 = vmatmul.mubr.bf16.vlgmr.msra.gmra.mrb[0].mxu0 %v790_v14  ;;  %758 = vmatpush3.bf16.msra.mxu1 %v804_v23 }
  0x58   :  { %731 = vmatprep.mubr.bf16.mxu0 %v791_v15 }
  0x5f   :  { %732 = vmatmul.mubr.bf16.gmra.mrb[4].mxu0 %v792_v18 }
  0x60   :  { %735 = vmatprep.mubr.bf16.mxu0 %v793_v19 }
  0x67   :  { %736 = vmatmul.mubr.bf16.gmra.mrb[8].mxu0 %v794_v20 }
  0x68   :  { %739 = vmatprep.mubr.bf16.mxu0 %v795_v21 }
  0x6f   :  { %740 = vmatmul.mubr.bf16.gmra.mrb[12].mxu0 %v796_v22 }
 0x12a   :  { %v729_v24 = vpop.f32.mrb[0].mxu0 }
 0x12b   :  { %v222_v25 = vpop.f32.mrb[1].mxu0 }
 0x12c   :  { %v730_v26 = vpop.f32.mrb[2].mxu0 }
 0x12d   :  { %v286_v27 = vpack.c.bf16 %v730_v26, %v729_v24  ;;  %v225_v28 = vpop.f32.mrb[3].mxu0 }
 0x12e   :  { %v285_v29 = vpack.c.bf16 %v225_v28, %v222_v25 }
 0x130   :  { %759 = vmatprep.mubr.bf16.mxu1 %v285_v29 }
 0x131   :  { %760 = vmatmul.mubr.bf16.vlgmr.msra.gmra.mrb[0].mxu1 %v286_v27 }
 0x132   :  { %v733_v30 = vpop.f32.mrb[4].mxu0 }
 0x133   :  { %v238_v31 = vpop.f32.mrb[5].mxu0 }
 0x134   :  { %v734_v32 = vpop.f32.mrb[6].mxu0 }
 0x135   :  { %v288_v33 = vpack.c.bf16 %v734_v32, %v733_v30  ;;  %v241_v34 = vpop.f32.mrb[7].mxu0 }
 0x136   :  { %v287_v35 = vpack.c.bf16 %v241_v34, %v238_v31 }
 0x138   :  { %763 = vmatprep.mubr.bf16.mxu1 %v287_v35 }
 0x139   :  { %764 = vmatmul.mubr.bf16.gmra.mrb[4].mxu1 %v288_v33 }
 0x13a   :  { %v737_v36 = vpop.f32.mrb[8].mxu0 }
 0x13b   :  { %v254_v37 = vpop.f32.mrb[9].mxu0 }
 0x13c   :  { %v738_v38 = vpop.f32.mrb[10].mxu0 }
 0x13d   :  { %v290_v39 = vpack.c.bf16 %v738_v38, %v737_v36  ;;  %v257_v40 = vpop.f32.mrb[11].mxu0 }
 0x13e   :  { %v289_v41 = vpack.c.bf16 %v257_v40, %v254_v37 }
 0x140   :  { %767 = vmatprep.mubr.bf16.mxu1 %v289_v41 }
 0x141   :  { %768 = vmatmul.mubr.bf16.gmra.mrb[8].mxu1 %v290_v39 }
 0x142   :  { %v741_v42 = vpop.f32.mrb[12].mxu0 }
 0x143   :  { %v270_v43 = vpop.f32.mrb[13].mxu0 }
 0x144   :  { %v742_v44 = vpop.f32.mrb[14].mxu0 }
 0x145   :  { %v292_v45 = vpack.c.bf16 %v742_v44, %v741_v42  ;;  %v273_v46 = vpop.f32.mrb[15].mxu0 }
 0x146   :  { %v291_v47 = vpack.c.bf16 %v273_v46, %v270_v43 }
 0x148   :  { %771 = vmatprep.mubr.bf16.mxu1 %v291_v47 }
 0x149   :  { %772 = vmatmul.mubr.bf16.gmra.mrb[12].mxu1 %v292_v45 }
 0x204   :  { %v761_v49 = vpop.f32.mrb[0].mxu1 }
 0x205   :  { %v407_v50 = vadd.f32 %v761_v49, %v591_v48  ;;  %v398_v51 = vpop.f32.mrb[1].mxu1 }
 0x206   :  { %v399_v52 = vadd.f32 %v591_v48, %v398_v51  ;;  %v762_v53 = vpop.f32.mrb[2].mxu1 }
 0x207   :  { %v410_v54 = vadd.f32 %v762_v53, %v591_v48  ;;  %v401_v55 = vpop.f32.mrb[3].mxu1  ;;  %v463_v57 = vmax.f32 %v407_v50, 0.0 }
 0x208   :  { %v402_v56 = vadd.f32 %v591_v48, %v401_v55  ;;  %v461_v59 = vmax.f32 %v399_v52, 0.0 }
 0x209   :  { %v464_v58 = vmax.f32 %v410_v54, 0.0 }
 0x20a   :  { %v462_v60 = vmax.f32 %v402_v56, 0.0 }
 0x20b   :  { %v640_v61 = vpack.c.bf16 %v464_v58, %v463_v57 }
 0x20c   :  { %v635_v62 = vpack.c.bf16 %v462_v60, %v461_v59  ;;  %v765_v63 = vpop.f32.mrb[4].mxu1 }
 0x20d   :  { %672 = vst [vmem:[#allocation8 + $0x8] sm:$0xff] %v640_v61   ;;  %v423_v0 = vadd.f32 %v765_v63, %v591_v48  ;;  %v414_v1 = vpop.f32.mrb[5].mxu1 }
 0x20e   :  { %636 = vst [vmem:[#allocation8] sm:$0xff] %v635_v62   ;;  %v415_v2 = vadd.f32 %v591_v48, %v414_v1  ;;  %v766_v3 = vpop.f32.mrb[6].mxu1 }
 0x20f   :  { %v426_v4 = vadd.f32 %v766_v3, %v591_v48  ;;  %v417_v5 = vpop.f32.mrb[7].mxu1  ;;  %v467_v7 = vmax.f32 %v423_v0, 0.0 }
 0x210   :  { %v418_v6 = vadd.f32 %v591_v48, %v417_v5  ;;  %v465_v9 = vmax.f32 %v415_v2, 0.0 }
 0x211   :  { %v468_v8 = vmax.f32 %v426_v4, 0.0 }
 0x212   :  { %v466_v10 = vmax.f32 %v418_v6, 0.0 }
 0x213   :  { %v650_v11 = vpack.c.bf16 %v468_v8, %v467_v7 }
 0x214   :  { %v645_v12 = vpack.c.bf16 %v466_v10, %v465_v9  ;;  %v769_v13 = vpop.f32.mrb[8].mxu1 }
 0x215   :  { %674 = vst [vmem:[#allocation8 + $0x18] sm:$0xff] %v650_v11   ;;  %v439_v14 = vadd.f32 %v769_v13, %v591_v48  ;;  %v430_v15 = vpop.f32.mrb[9].mxu1 }
 0x216   :  { %673 = vst [vmem:[#allocation8 + $0x10] sm:$0xff] %v645_v12   ;;  %v431_v16 = vadd.f32 %v591_v48, %v430_v15  ;;  %v770_v17 = vpop.f32.mrb[10].mxu1 }
 0x217   :  { %v442_v18 = vadd.f32 %v770_v17, %v591_v48  ;;  %v433_v19 = vpop.f32.mrb[11].mxu1  ;;  %v471_v21 = vmax.f32 %v439_v14, 0.0 }
 0x218   :  { %v434_v20 = vadd.f32 %v591_v48, %v433_v19  ;;  %v469_v23 = vmax.f32 %v431_v16, 0.0 }
 0x219   :  { %v472_v22 = vmax.f32 %v442_v18, 0.0 }
 0x21a   :  { %v470_v24 = vmax.f32 %v434_v20, 0.0 }
 0x21b   :  { %v660_v25 = vpack.c.bf16 %v472_v22, %v471_v21 }
 0x21c   :  { %v655_v26 = vpack.c.bf16 %v470_v24, %v469_v23  ;;  %v773_v27 = vpop.f32.mrb[12].mxu1 }
 0x21d   :  { %676 = vst [vmem:[#allocation8 + $0x28] sm:$0xff] %v660_v25   ;;  %v455_v28 = vadd.f32 %v773_v27, %v591_v48  ;;  %v446_v29 = vpop.f32.mrb[13].mxu1 }
 0x21e   :  { %675 = vst [vmem:[#allocation8 + $0x20] sm:$0xff] %v655_v26   ;;  %v447_v30 = vadd.f32 %v591_v48, %v446_v29  ;;  %v774_v31 = vpop.f32.mrb[14].mxu1 }
 0x21f   :  { %v458_v32 = vadd.f32 %v774_v31, %v591_v48  ;;  %v449_v33 = vpop.f32.mrb[15].mxu1  ;;  %v475_v35 = vmax.f32 %v455_v28, 0.0 }
 0x220   :  { %v450_v34 = vadd.f32 %v591_v48, %v449_v33  ;;  %v473_v37 = vmax.f32 %v447_v30, 0.0 }
 0x221   :  { %v476_v36 = vmax.f32 %v458_v32, 0.0 }
 0x222   :  { %v474_v38 = vmax.f32 %v450_v34, 0.0 }
 0x223   :  { %v670_v39 = vpack.c.bf16 %v476_v36, %v475_v35 }
 0x224   :  { %v665_v40 = vpack.c.bf16 %v474_v38, %v473_v37 }
 0x225   :  { %678 = vst [vmem:[#allocation8 + $0x38] sm:$0xff] %v670_v39  }
 0x226   :  { %677 = vst [vmem:[#allocation8 + $0x30] sm:$0xff] %v665_v40  }
 0x227   :  { %882 = shalt.err (!%p879_p0)
}
 0x228   :  { %s883_s6 = scalar_lea.hbm %s1004_s4, 1024 }
 0x229   :  { %p884_p1 = scmp.ne.s32.totalorder %s1004_s4, %s883_s6  ;;  %p887_p2 = scmp.lt.u32.totalorder %s883_s6, %s1004_s4 }
 0x22b   :  { %p889_p3 = pnand %p887_p2, %p884_p1 }
 0x22d   :  { %892 = shalt.err (!%p889_p3)
}
 0x22e   :  { %568 = dma.vmem_to_hbm [thread:$0]  %s563_s26, 1024, %s1004_s4, [#allocation4], %s901_s27, %s901_s27, %s902_s28  }
 0x22f   :  { %897 = dma.done.wait [#allocation4], 1024  }
 0x230   :  { %898 = vsyncadd [#allocation4], 4294966272 }
 0x231   :  { %572 = vsyncpa [#allocation3], 1 }
 0x232   :  { %573 = vsyncpa [#allocation6], 1 }
 0x233   :  { %574 = vsyncpa [#allocation4], 1 }

</bundles_post_ra>
